<compile_context>
chip_gen: v5e
topology: v5e:2x2
jax: 0.10.0
libtpu: 0.0.40
codegen_flags: <defaults>
</compile_context>

<pallas_src>
import functools

import jax
import jax.numpy as jnp
from jax.experimental import pallas as pl
from jax.experimental.pallas import tpu as pltpu

LN_EPS = 1e-5  # PyTorch nn.LayerNorm default


def _patch_embed_kernel(x_ref, wt_ref, gamma_ref, posb_ref, o_ref, *, matmul_dtype):
    x = x_ref[...]
    if matmul_dtype is not None:
        # In-kernel cast: unlocks full bf16 MXU rate without an extra
        # wrapper-side HBM pass over x.
        x = x.astype(matmul_dtype)
    # fc: (tm, C_in) @ (C_in, E) -> (tm, E) on the MXU, accumulate in f32.
    h = jnp.dot(x, wt_ref[...], preferred_element_type=jnp.float32)
    # LayerNorm over last dim (biased variance, like torch), all in f32.
    # var = E[h^2] - E[h]^2 saves one full (tm, E) elementwise pass.
    mean = jnp.mean(h, axis=-1, keepdims=True)
    mean_sq = jnp.mean(h * h, axis=-1, keepdims=True)
    var = jnp.maximum(mean_sq - mean * mean, 0.0)
    normed = (h - mean) * jax.lax.rsqrt(var + LN_EPS)
    # gamma scale + (beta + positional encoding) fused add.
    o_ref[...] = (normed * gamma_ref[...] + posb_ref[...]).astype(o_ref.dtype)


def _position_encoding(n, emb_dim):
    # Matches PatchEmbedding.position_encoding (torch) exactly.
    pos = jnp.arange(n, dtype=jnp.float32)
    inv_freq = 1.0 / (10000.0 ** (jnp.arange(0, emb_dim, 2, dtype=jnp.float32)
                                  / emb_dim))
    angles = pos[:, None] * inv_freq[None, :]
    return jnp.concatenate([jnp.sin(angles), jnp.cos(angles)], axis=-1)


def _round_up(v, m):
    return ((v + m - 1) // m) * m


def _vmem_budget_bytes():
    """Generation-aware scoped-VMEM budget with headroom for compiler scratch."""
    cap = 64 * 1024 * 1024  # conservative fallback (== v7x per-TC physical VMEM)
    try:
        cap = int(pltpu.get_tpu_info().vmem_capacity_bytes)
    except Exception:  # pragma: no cover - non-TPU / older API fallback
        pass
    # Leave ~12 MiB headroom; never ask for more than ~100 MiB even on 128 MiB
    # parts (v5e/v6e), and never less than the 32 MiB default.
    return max(32 * 1024 * 1024, min(cap - 12 * 1024 * 1024, 100 * 1024 * 1024))


@functools.partial(jax.jit,
                   static_argnames=("tm", "use_bf16_matmul", "out_dtype"))
def patch_embedding(x, w, gamma, beta, *, tm=512, use_bf16_matmul=False,
                    out_dtype=None):
    """x: (B, N, C_in); w: (E, C_in) (torch Linear weight); gamma/beta: (E,)."""
    b, n, c_in = x.shape
    emb = w.shape[0]
    assert emb % 2 == 0, "position encoding requires an even embedding dim"

    out_dtype = jnp.dtype(out_dtype) if out_dtype is not None else x.dtype
    matmul_dtype = jnp.bfloat16 if use_bf16_matmul else None

    # Row tile: multiple of 8 (sublane); clamp for tiny N so we don't
    # over-allocate. Partial last tile is handled by Pallas block clipping, so
    # no wrapper pad / slice is needed.
    tm_eff = min(_round_up(tm, 8), _round_up(n, 8))

    wt = w.T  # (C_in, E) -- resident in VMEM across the whole grid
    if use_bf16_matmul:
        wt = wt.astype(jnp.bfloat16)  # tiny + resident: cast once in wrapper
    gamma2 = gamma.reshape(1, emb).astype(jnp.float32)
    # Position table over (N, E); fold LN beta into it (both row-constant).
    pos_beta = _position_encoding(n, emb) + beta.reshape(1, emb).astype(jnp.float32)

    # --- VMEM footprint: double-buffered streamed tiles + resident operands ---
    x_bytes = jnp.dtype(x.dtype).itemsize
    wt_bytes = jnp.dtype(wt.dtype).itemsize
    out_bytes = jnp.dtype(out_dtype).itemsize

    def _footprint(t):
        return (2 * t * c_in * x_bytes        # x tile (double-buffered)
                + 2 * t * emb * out_bytes     # output tile
                + 2 * t * emb * 4             # pos+beta tile (f32)
                + 2 * c_in * emb * wt_bytes   # resident weight buffers
                + 2 * emb * 4)                # gamma

    budget = _vmem_budget_bytes()
    # Auto-shrink the tile instead of failing to compile on huge C_in / E.
    while tm_eff > 8 and int(1.5 * _footprint(tm_eff)) > budget:
        tm_eff = max(8, _round_up(tm_eff // 2, 8))
    vmem_limit = int(min(max(1.5 * _footprint(tm_eff), 32 * 1024 * 1024), budget))

    n_tiles = pl.cdiv(n, tm_eff)

    kernel = functools.partial(_patch_embed_kernel, matmul_dtype=matmul_dtype)

    out = pl.pallas_call(
        kernel,
        out_shape=jax.ShapeDtypeStruct((b, n, emb), out_dtype),
        grid_spec=pltpu.PrefetchScalarGridSpec(
            num_scalar_prefetch=0,
            # batch innermost: pos+beta / weight / gamma block indices are
            # unchanged across consecutive steps -> no per-batch refetch.
            grid=(n_tiles, b),
            in_specs=[
                # x rows for this (tile, batch); batch dim squeezed out.
                pl.BlockSpec((None, tm_eff, c_in), lambda j, bi: (bi, j, 0)),
                # weight, resident across the whole grid.
                pl.BlockSpec((c_in, emb), lambda j, bi: (0, 0)),
                # LN gamma, resident.
                pl.BlockSpec((1, emb), lambda j, bi: (0, 0)),
                # pos+beta table, indexed per n-tile (constant over batch, the
                # inner grid axis, so it is fetched once per tile).
                pl.BlockSpec((tm_eff, emb), lambda j, bi: (j, 0)),
            ],
            out_specs=pl.BlockSpec((None, tm_eff, emb),
                                   lambda j, bi: (bi, j, 0)),
        ),
        compiler_params=pltpu.CompilerParams(
            dimension_semantics=("parallel", "parallel"),
            vmem_limit_bytes=vmem_limit),
    )(x, wt, gamma2, pos_beta)

    return out


def _reference(x, w, gamma, beta):
    h = jnp.einsum("bnc,ec->bne", x, w)
    mean = jnp.mean(h, axis=-1, keepdims=True)
    var = jnp.mean((h - mean) ** 2, axis=-1, keepdims=True)
    y = (h - mean) / jnp.sqrt(var + LN_EPS) * gamma + beta
    pos = _position_encoding(x.shape[1], w.shape[0])
    return y + pos[None]


if __name__ == "__main__":
    B, N, IN_SIZE, EMB = 2, 8, 16, 32

    key = jax.random.PRNGKey(0)
    kx, kw = jax.random.split(key)
    x = jax.random.normal(kx, (B, N, IN_SIZE), dtype=jnp.float32)
    w = 0.1 * jax.random.normal(kw, (EMB, IN_SIZE), dtype=jnp.float32)
    gamma = jnp.ones((EMB,), dtype=jnp.float32)
    beta = jnp.zeros((EMB,), dtype=jnp.float32)

    out = patch_embedding(x, w, gamma, beta)
    out = jax.block_until_ready(out)

    ref = _reference(x, w, gamma, beta)
    assert out.shape == (B, N, EMB)
    assert jnp.allclose(out, ref, atol=1e-4, rtol=1e-4)
    print("KERNEL_OK")
</pallas_src>

<mosaic_0001>
module attributes {stable_mosaic.version = 11 : i64} {
  func.func @_patch_embed_kernel(%arg0: i32, %arg1: i32, %arg2: memref<1x8x16xf32, #tpu.memory_space<vmem>>, %arg3: memref<16x32xf32, #tpu.memory_space<vmem>>, %arg4: memref<1x32xf32, #tpu.memory_space<vmem>>, %arg5: memref<8x32xf32, #tpu.memory_space<vmem>>, %arg6: memref<1x8x32xf32, #tpu.memory_space<vmem>>) attributes {dimension_semantics = [#tpu.dimension_semantics<parallel>, #tpu.dimension_semantics<parallel>], iteration_bounds = array<i64: 1, 2>, scalar_prefetch = 0 : i64, scratch_operands = 0 : i64, tpu.core_type = #tpu.core_type<tc>, window_params = [{transform_indices = @transform_0, window_bounds = array<i64: 1, 8, 16>}, {pipeline_mode = #tpu.pipeline_mode<synchronous>, transform_indices = @transform_1, window_bounds = array<i64: 16, 32>}, {pipeline_mode = #tpu.pipeline_mode<synchronous>, transform_indices = @transform_2, window_bounds = array<i64: 1, 32>}, {transform_indices = @transform_3, window_bounds = array<i64: 8, 32>}, {transform_indices = @transform_4, window_bounds = array<i64: 1, 8, 32>}]} {
    %c0 = arith.constant 0 : index
    %c0_0 = arith.constant 0 : index
    %c0_1 = arith.constant 0 : index
    %0 = vector.load %arg2[%c0, %c0_0, %c0_1] : memref<1x8x16xf32, #tpu.memory_space<vmem>>, vector<1x8x16xf32>
    %1 = vector.shape_cast %0 : vector<1x8x16xf32> to vector<8x16xf32>
    %c0_2 = arith.constant 0 : index
    %c0_3 = arith.constant 0 : index
    %2 = vector.load %arg3[%c0_2, %c0_3] : memref<16x32xf32, #tpu.memory_space<vmem>>, vector<16x32xf32>
    %cst = arith.constant dense<0.000000e+00> : vector<8x32xf32>
    %3 = tpu.matmul %1, %2, %cst {dimension_numbers = #tpu.dot_dimension_numbers<[1], [0], [0], [1], [0, 0, 1, 1], [], []>} : vector<8x16xf32>, vector<16x32xf32>, vector<8x32xf32> -> vector<8x32xf32>
    %cst_4 = arith.constant dense<0.000000e+00> : vector<8xf32>
    %4 = vector.multi_reduction <add>, %3, %cst_4 [1] : vector<8x32xf32> to vector<8xf32>
    %5 = vector.shape_cast %4 : vector<8xf32> to vector<8x1xf32>
    %cst_5 = arith.constant 3.200000e+01 : f32
    %6 = vector.broadcast %cst_5 : f32 to vector<8x1xf32>
    %7 = arith.divf %5, %6 : vector<8x1xf32>
    %8 = arith.mulf %3, %3 : vector<8x32xf32>
    %cst_6 = arith.constant dense<0.000000e+00> : vector<8xf32>
    %9 = vector.multi_reduction <add>, %8, %cst_6 [1] : vector<8x32xf32> to vector<8xf32>
    %10 = vector.shape_cast %9 : vector<8xf32> to vector<8x1xf32>
    %cst_7 = arith.constant 3.200000e+01 : f32
    %11 = vector.broadcast %cst_7 : f32 to vector<8x1xf32>
    %12 = arith.divf %10, %11 : vector<8x1xf32>
    %13 = arith.mulf %7, %7 : vector<8x1xf32>
    %14 = arith.subf %12, %13 : vector<8x1xf32>
    %cst_8 = arith.constant 0.000000e+00 : f32
    %15 = vector.broadcast %cst_8 : f32 to vector<8x1xf32>
    %16 = arith.maximumf %14, %15 : vector<8x1xf32>
    %17 = vector.broadcast %7 : vector<8x1xf32> to vector<8x32xf32>
    %18 = arith.subf %3, %17 : vector<8x32xf32>
    %cst_9 = arith.constant 9.99999974E-6 : f32
    %19 = vector.broadcast %cst_9 : f32 to vector<8x1xf32>
    %20 = arith.addf %16, %19 : vector<8x1xf32>
    %21 = math.rsqrt %20 : vector<8x1xf32>
    %22 = vector.broadcast %21 : vector<8x1xf32> to vector<8x32xf32>
    %23 = arith.mulf %18, %22 : vector<8x32xf32>
    %c0_10 = arith.constant 0 : index
    %c0_11 = arith.constant 0 : index
    %24 = vector.load %arg4[%c0_10, %c0_11] : memref<1x32xf32, #tpu.memory_space<vmem>>, vector<1x32xf32>
    %25 = vector.broadcast %24 : vector<1x32xf32> to vector<8x32xf32>
    %26 = arith.mulf %23, %25 : vector<8x32xf32>
    %c0_12 = arith.constant 0 : index
    %c0_13 = arith.constant 0 : index
    %27 = vector.load %arg5[%c0_12, %c0_13] : memref<8x32xf32, #tpu.memory_space<vmem>>, vector<8x32xf32>
    %28 = arith.addf %26, %27 : vector<8x32xf32>
    %c0_14 = arith.constant 0 : index
    %c0_15 = arith.constant 0 : index
    %c0_16 = arith.constant 0 : index
    %29 = vector.load %arg6[%c0_14, %c0_15, %c0_16] : memref<1x8x32xf32, #tpu.memory_space<vmem>>, vector<1x8x32xf32>
    %30 = vector.shape_cast %29 : vector<1x8x32xf32> to vector<8x32xf32>
    %31 = vector.shape_cast %28 : vector<8x32xf32> to vector<1x8x32xf32>
    tpu.vector_store %arg6[%c0_14, %c0_15, %c0_16], %31 {strides = array<i32>} : memref<1x8x32xf32, #tpu.memory_space<vmem>>, vector<1x8x32xf32>,
    return
  }
  func.func @transform_0(%arg0: i32, %arg1: i32) -> (i32, i32, i32) {
    %c0_i32 = arith.constant 0 : i32
    %c0_i32_0 = arith.constant 0 : i32
    return %arg1, %arg0, %c0_i32 : i32, i32, i32
  }
  func.func @transform_1(%arg0: i32, %arg1: i32) -> (i32, i32) {
    %c0_i32 = arith.constant 0 : i32
    %c0_i32_0 = arith.constant 0 : i32
    %c0_i32_1 = arith.constant 0 : i32
    return %c0_i32, %c0_i32_0 : i32, i32
  }
  func.func @transform_2(%arg0: i32, %arg1: i32) -> (i32, i32) {
    %c0_i32 = arith.constant 0 : i32
    %c0_i32_0 = arith.constant 0 : i32
    %c0_i32_1 = arith.constant 0 : i32
    return %c0_i32, %c0_i32_0 : i32, i32
  }
  func.func @transform_3(%arg0: i32, %arg1: i32) -> (i32, i32) {
    %c0_i32 = arith.constant 0 : i32
    %c0_i32_0 = arith.constant 0 : i32
    return %arg0, %c0_i32 : i32, i32
  }
  func.func @transform_4(%arg0: i32, %arg1: i32) -> (i32, i32, i32) {
    %c0_i32 = arith.constant 0 : i32
    %c0_i32_0 = arith.constant 0 : i32
    return %arg1, %arg0, %c0_i32 : i32, i32, i32
  }
}

</mosaic_0001>

<bundles_post_ra>
// kernel: patch_embedding.1
= control target key start
LH: loop header
LB: loop body
LE: loop exit
PB: predicated region body
PF: predicated region fallthrough
CT: control target
= control target key end

     0   :  { %9 = vsyncpa [#allocation3], 0  ;;  %s698_s0 = inlined_call_operand.vmem [shape: f32[2,8,16], index: 0, kind: input, shape index: {}]   ;;  %s699_s1 = inlined_call_operand.vmem [shape: f32[16,32], index: 1, kind: input, shape index: {}]   ;;  %s700_s2 = inlined_call_operand.vmem [shape: f32[1,32], index: 2, kind: input, shape index: {}]   ;;  %s701_s3 = inlined_call_operand.vmem [shape: f32[8,32], index: 3, kind: input, shape index: {}]   ;;  %s702_s4 = inlined_call_operand.hbm [shape: f32[2,8,32], index: 4, kind: output, shape index: {}]  }
   0x1   :  { %11 = vsyncpa [#allocation3 + $0x1], 0  ;;  %s586_s15 = smov 0   ;;  %s588_s16 = smov 0  }
   0x2   :  { %s590_s17 = smov 0   ;;  %s592_s18 = smov 0  }
   0x3   :  { %s594_s19 = smov 0   ;;  %s596_s20 = smov 0  }
   0x4 LB: > { %s406_s21 = sadd.s32 4294967295, %s558_s20   ;;  %s407_s22 = sadd.s32 4294967294, %s558_s20   ;;  %s558_s20 = sphi %s596_s20, %s17_s20   ;;  %s554_s19 = sphi %s594_s19, %s709_s19   ;;  %s550_s18 = sphi %s592_s18, %s708_s18   ;;  %s546_s17 = sphi %s590_s17, %s707_s17   ;;  %s542_s16 = sphi %s588_s16, %s706_s16   ;;  %s538_s15 = sphi %s586_s15, %s705_s15  }
   0x5   : > { %s26_s23 = sadd.s32 1, %s554_s19  ;;  %s134_s24 = sadd.s32 1, %s546_s17 }
   0x6   : > { %p27_p0 = scmp.ge.s32.totalorder %s26_s23, 2  ;;  %p144_p1 = scmp.ne.s32.totalorder %s546_s17, %s542_s16 }
   0x7   : > { %p145_p2 = scmp.eq.s32.totalorder %s406_s21, 1  ;;  %p150_p3 = scmp.ne.s32.totalorder %s542_s16, %s538_s15 }
   0x8   : > { %s711_s23 = smov (%p27_p0, %s26_s23), 0  ;;  %p151_p5 = scmp.eq.s32.totalorder %s407_s22, 1 }
   0x9   : > { %p626_p4 = por %p145_p2, %p144_p1  ;;  %s129_s26 = ssub.s32 %s554_s19, %s711_s23 }
   0xa   : > { %p411_p6 = scmp.ge.s32.totalorder %s558_s20, 1  ;;  %p132_p7 = scmp.eq.s32.totalorder %s129_s26, 0 }
   0xb   : > { %p633_p8 = por %p151_p5, %p150_p3  ;;  %p192_p9 = scmp.lt.s32.totalorder %s558_s20, 3 }
   0xc   : > { %s639_s28 = scalar_select %p132_p7, %s546_s17, %s134_s24  }
   0xd   : > { %p193_p10 = pnand %p411_p6, %p192_p9 }
   0xe   : > { %p224_p11 = scmp.lt.s32.totalorder (!%p193_p10), %s550_s18, 1  ;;  %s221_s12 = sand.u32 (!%p193_p10), 1, %s542_s16  }
   0xf   : > { %196 = sbr.rel (%p193_p10) target bundleno = 311 (0x137), region = 36  ;;  %s412_s13 = sshll.u32 (!%p193_p10), %s221_s12, 3 }
  0x10   : > { %s416_s14 = sshll.u32 (!%p193_p10), %s550_s18, 3 }
  0x11   : > { %s315_s29 = scalar_lea.hbm (!%p193_p10), %s702_s4, %s416_s14 }
  0x14   : > { %v237_v0 = vld [vmem:[%s699_s1 + $0x8] sm:$0xff]  ;;  %v236_v1 = vld [vmem:[%s699_s1] sm:$0xff]  ;;  %s225_s7 = scalar_select %p224_p11, %s550_s18, 1  ;;  %vm238_vm0 = vcmask 130048   ;;  %vm262_vm1 = vcmask 261120   ;;  %v560_v7 = vmov 32.0  }
  0x15   : > { %256 = vmatpush.msra.mxu0 %v237_v0  ;;  %476 = vrcp.f32 %v560_v7  ;;  %v475_v29 = vld [vmem:[%s700_s2] ss:$0 sm:$0xff]  ;;  %s223_s18 = scalar_lea.vmem [#allocation2], %s412_s13  ;;  %s500_s13 = scalar_lea.hbm %s702_s4, 16 }
  0x16   : > { %s413_s8 = sshll.u32 %s225_s7, 3  ;;  %v300_v32 = vld [vmem:[%s701_s3] sm:$0xff]  ;;  %s317_s6 = sshll.u32 %s223_s18, 4  ;;  %s318_s6 = int_to_ptr.vmem [resolvable:$true] %s317_s6 }
  0x17   : > { %257 = vmatpush.msra.mxu0 %v236_v1  ;;  %s230_s11 = scalar_lea.vmem %s698_s0, %s413_s8  ;;  %s319_s7 = sshll.u32 %s315_s29, 4  ;;  %s320_s7 = int_to_ptr.hbm [resolvable:$true] %s319_s7 }
  0x18   : > { %v235_v2 = vld [vmem:[%s230_s11] sm:$0xff]  ;;  %s304_s8 = scalar_lea.sflag [#allocation3], %s221_s12  ;;  %s494_s9 = sshra.s32 %s320_s7, 4  ;;  %s495_s9 = int_to_ptr.hbm [resolvable:$true] %s494_s9 }
  0x19   : > { %414 = vmatmul.msk.f32.vlgmr.msra.gmra.mxu0 %vm238_vm0, %v235_v2  ;;  %s496_s10 = scalar_lea.hbm %s495_s9, 8  ;;  %p501_p1 = scmp.lt.s32.totalorder %s495_s9, %s702_s4 }
  0x1a   : > { %p497_p12 = scmp.ne.s32.totalorder %s495_s9, %s496_s10  ;;  %p502_p2 = scmp.lt.s32.totalorder %s500_s13, %s496_s10 }
  0x1b   : > { %v477_v8 = vpop.eup %476 }
  0x1c   : > { %v267_v9 = vmul.f32 32.0, %v477_v8  ;;  %vm271_vm2 = vweird.f32 %v477_v8  ;;  %p498_p13 = pnand %p497_p12, %p626_p4  ;;  %p503_p3 = por %p502_p2, %p501_p1 }
  0x1e   : > { %v268_v10 = vsub.f32 1.0, %v267_v9  ;;  %p499_p0 = pneg %p498_p13 }
  0x20   : > { %v269_v11 = vmul.f32 %v477_v8, %v268_v10  ;;  %p504_p5 = pnand %p503_p3, %p499_p0 }
  0x22   : > { %v270_v12 = vadd.f32 %v477_v8, %v269_v11 }
  0x24   : > { %v272_v14 = vsel %vm271_vm2, %v477_v8, %v270_v12 }
  0x96   : > { %v259_v3 = vpop.f32.mrf.mxu0 }
  0x97   : > { %v263_v4 = vsel %vm262_vm1, %v259_v3, 0.0  ;;  %v274_v5 = vmul.f32 %v259_v3, %v259_v3 }
  0x98   : > { %264 = vadd.xlane.f32.xlu0 %v263_v4 }
  0x99   : > { %v275_v6 = vsel %vm262_vm1, %v274_v5, 0.0 }
  0xa0   : > { %276 = vadd.xlane.f32.xlu0 %v275_v6 }
 0x10b   : > { %v265_v13 = vpop.xlane.xlu0 %264 }
 0x10c   : > { %v273_v15 = vmul.f32 %v272_v14, %v265_v13 }
 0x10e   : > { %v279_v17 = vmul.f32 %v273_v15, %v273_v15  ;;  %v282_v28 = vsub.f32 %v259_v3, %v273_v15 }
 0x113   : > { %v277_v16 = vpop.xlane.xlu0 %276 }
 0x114   : > { %v278_v18 = vmul.f32 %v277_v16, %v272_v14 }
 0x116   : > { %v280_v19 = vsub.f32 %v278_v18, %v279_v17 }
 0x118   : > { %v281_v20 = vmax.f32 %v280_v19, 0.0 }
 0x11a   : > { %v283_v21 = vadd.f32 1e-05, %v281_v20 }
 0x11c   : > { %478 = vrsqrt.f32 %v283_v21  ;;  %vm290_vm4 = vweird.f32 %v283_v21 }
 0x122   : > { %v479_v22 = vpop.eup %478 }
 0x123   : > { %v285_v23 = vmul.f32 %v479_v22, %v283_v21  ;;  %vm291_vm3 = vweird.f32 %v479_v22 }
 0x124   : > { %vm292_vm5 = vmor %vm290_vm4, %vm291_vm3 }
 0x125   : > { %v286_v24 = vmul.f32 %v479_v22, %v285_v23 }
 0x127   : > { %v287_v25 = vmul.f32 0.5, %v286_v24 }
 0x129   : > { %v288_v26 = vsub.f32 1.5, %v287_v25 }
 0x12b   : > { %v289_v27 = vmul.f32 %v479_v22, %v288_v26 }
 0x12d   : > { %v293_v30 = vsel %vm292_vm5, %v479_v22, %v289_v27 }
 0x12e   : > { %v294_v31 = vmul.f32 %v293_v30, %v282_v28 }
 0x130   : > { %v299_v33 = vmul.f32 %v475_v29, %v294_v31 }
 0x132   : > { %v301_v34 = vadd.f32 %v300_v32, %v299_v33 }
 0x134   : > { %302 = vst.msk [vmem:[%s223_s18] sm:$0xff] %vm262_vm1, %v301_v34 }
 0x135   : > { %507 = shalt.err (!%p504_p5)
}
 0x136   : > { %419 = dma.vmem_to_hbm [thread:$0]  (%p626_p4), %s318_s6, 128, %s320_s7, %s304_s8  }
 0x137 PF: > { %p425_p6 = scmp.ge.s32.totalorder %s558_s20, 2  ;;  %s331_s12 = sand.u32 1, %s538_s15  }
 0x138   : > { %s332_s24 = scalar_lea.sflag [#allocation3], %s331_s12 }
 0x139   : > { %p422_p7 = pnand %p425_p6, %p633_p8 }
 0x13b   : > { %p423_p9 = pneg %p422_p7 }
 0x13d   : > { %533 = dma.done.wait (%p423_p9), %s332_s24, 128  }
 0x13e   : > { %535 = vsyncadd (%p423_p9), %s332_s24, 4294967168  ;;  %s17_s20 = sadd.s32 1, %s558_s20   ;;  %s705_s15 = smov %s542_s16 }
 0x13f   : > { %p14_p10 = scmp.ge.s32.totalorder %s17_s20, 4   ;;  %s706_s16 = smov %s546_s17 }
 0x140   : > { %s707_s17 = smov %s639_s28  ;;  %s708_s18 = smov %s554_s19 }
 0x141   : > { %s709_s19 = smov %s711_s23  ;;  %16 = sbr.rel (!%p14_p10) target bundleno = 4 (0x4), region = 74 }
 0x146   :  { %338 = vsyncpa [#allocation3], 1 }
 0x147   :  { %340 = vsyncpa [#allocation3 + $0x1], 1 }

</bundles_post_ra>
